<compile_context>
chip_gen: v7x
topology: tpu7x:2x2x1
jax: 0.10.0
libtpu: 0.0.40
codegen_flags: <defaults>
</compile_context>

<pallas_src>
import functools

import jax
import jax.numpy as jnp
from jax.experimental import pallas as pl
from jax.experimental.pallas import tpu as pltpu

LANE = 128      # TPU lane width (last dim)
SUBLANE = 16    # bf16 sublane packing (second-minor dim)


def _round_up(x, m):
    return (x + m - 1) // m * m


def _fused_sage_kernel(*refs, n_layers):
    """Fused n-layer GraphSAGE('mean') forward. Single grid point, all VMEM.

    refs = (a_0..a_{L-1}, x, w_cat_0, b_0, ..., w_cat_{L-1}, b_{L-1}, out)
      a_i    : bf16 [n_dst_pad_i, n_src_pad_i]   (row-normalized mean adjacency)
      x      : bf16 [n_src_pad_0, F_pad]
      w_cat_i: bf16 [2*F_pad, F_pad]             ([W_self; W_neigh], zero-padded)
      b_i    : f32  [1, F_pad]
      out    : f32  [n_dst_pad_{L-1}, F_pad]
    """
    a_refs = refs[:n_layers]
    x_ref = refs[n_layers]
    wb_refs = refs[n_layers + 1:-1]
    out_ref = refs[-1]

    h = x_ref[...]                                  # bf16, lives in VMEM/vregs
    for i in range(n_layers):
        a = a_refs[i][...]
        w = wb_refs[2 * i][...]
        b = wb_refs[2 * i + 1][...]
        n_dst_pad = a.shape[0]

        # Mean aggregation on the MXU: [n_dst, n_src] @ [n_src, F] -> f32.
        h_neigh = jnp.dot(a, h, preferred_element_type=jnp.float32)

        # Fused self + neighbor projection: one wide matmul (K = 2*F_pad).
        # dst nodes are a prefix of src nodes -> static slice of the value.
        z = jnp.concatenate([h[:n_dst_pad], h_neigh.astype(jnp.bfloat16)], axis=-1)
        out = jnp.dot(z, w, preferred_element_type=jnp.float32) + b

        if i != n_layers - 1:
            out = jnp.maximum(out, 0.0)             # activation (ReLU)
            # TODO(synk): dropout = identity (deterministic / eval mode)
            h = out.astype(jnp.bfloat16)            # bf16 for the next MXU pass
        else:
            h = out                                 # keep final layer in f32

    out_ref[...] = h.astype(out_ref.dtype)


class DistSAGEPallas:
    """JAX/Pallas equivalent of the PyTorch DistSAGE module (forward only)."""

    def __init__(self, in_feats, n_hidden, n_classes, n_layers, key):
        self.n_layers = n_layers
        self.n_classes = n_classes
        dims = [in_feats] + [n_hidden] * (n_layers - 1) + [n_classes]
        self.f_pad = _round_up(max(dims), LANE)

        self.params = []      # packed: (w_cat bf16 [2*F_pad, F_pad], bias f32 [1, F_pad])
        self.raw_params = []  # unpadded f32 (for the pure-JAX reference)
        for i in range(n_layers):
            f_in, f_out = dims[i], dims[i + 1]
            key, k1, k2 = jax.random.split(key, 3)
            scale = 1.0 / jnp.sqrt(jnp.float32(f_in))
            w_self = jax.random.uniform(k1, (f_in, f_out), jnp.float32, -scale, scale)
            w_neigh = jax.random.uniform(k2, (f_in, f_out), jnp.float32, -scale, scale)
            bias = jnp.zeros((f_out,), jnp.float32)
            self.raw_params.append((w_self, w_neigh, bias))

            # Pre-concatenate + zero-pad once on the host:
            #   rows [0, F_pad)        <- W_self   (matches h_dst lanes of z)
            #   rows [F_pad, 2*F_pad)  <- W_neigh  (matches h_neigh lanes of z)
            w_cat = jnp.zeros((2 * self.f_pad, self.f_pad), jnp.float32)
            w_cat = w_cat.at[:f_in, :f_out].set(w_self)
            w_cat = w_cat.at[self.f_pad:self.f_pad + f_in, :f_out].set(w_neigh)
            b_pad = jnp.zeros((1, self.f_pad), jnp.float32).at[0, :f_out].set(bias)
            self.params.append((w_cat.astype(jnp.bfloat16), b_pad))

    def forward(self, blocks, x):
        assert len(blocks) == self.n_layers
        F = self.f_pad

        # Pad node features: rows -> multiple of 16 (bf16 sublanes), cols -> 128 lanes.
        n_src, f_in = x.shape
        n_src_pad = _round_up(n_src, SUBLANE)
        x_pad = jnp.zeros((n_src_pad, F), jnp.bfloat16)
        x_pad = x_pad.at[:n_src, :f_in].set(x.astype(jnp.bfloat16))

        # Pad the mean-aggregation matrices (zero rows/cols keep the math exact).
        a_pads = []
        prev_rows, prev_pad = n_src, n_src_pad
        for a in blocks:
            n_dst, n_src_i = a.shape
            assert n_src_i == prev_rows, "dst nodes must be a prefix of src nodes"
            n_dst_pad = _round_up(n_dst, SUBLANE)
            a_pad = jnp.zeros((n_dst_pad, prev_pad), jnp.bfloat16)
            a_pad = a_pad.at[:n_dst, :n_src_i].set(a.astype(jnp.bfloat16))
            a_pads.append(a_pad)
            prev_rows, prev_pad = n_dst, n_dst_pad
        n_out, n_out_pad = prev_rows, prev_pad

        flat_params = [t for wb in self.params for t in wb]
        n_inputs = self.n_layers + 1 + 2 * self.n_layers
        vmem = pl.BlockSpec(memory_space=pltpu.MemorySpace.VMEM)
        kernel = functools.partial(_fused_sage_kernel, n_layers=self.n_layers)

        out = pl.pallas_call(
            kernel,
            out_shape=jax.ShapeDtypeStruct((n_out_pad, F), jnp.float32),
            in_specs=[vmem] * n_inputs,
            out_specs=vmem,
        )(*a_pads, x_pad, *flat_params)

        return out[:n_out, :self.n_classes]

    def reference_forward(self, blocks, x):
        """Pure-JAX f32 reference with DGL SAGEConv('mean') semantics."""
        h = x
        for i, (a, (w_self, w_neigh, bias)) in enumerate(zip(blocks, self.raw_params)):
            n_dst = a.shape[0]
            h_neigh = a @ h
            h = h[:n_dst] @ w_self + h_neigh @ w_neigh + bias
            if i != self.n_layers - 1:
                h = jnp.maximum(h, 0.0)
        return h


def make_mean_block(key, n_dst, n_src):
    """Dense row-normalized adjacency [n_dst, n_src]: mean aggregation matrix."""
    adj = (jax.random.uniform(key, (n_dst, n_src)) < 0.3).astype(jnp.float32)
    # guarantee at least one neighbor per dst node (connect dst v to src v)
    adj = adj.at[jnp.arange(n_dst), jnp.arange(n_dst)].set(1.0)
    deg = jnp.sum(adj, axis=1, keepdims=True)
    return adj / deg


if __name__ == "__main__":
    key = jax.random.PRNGKey(0)
    key, k_model, k_x, kb0, kb1, kb2 = jax.random.split(key, 6)

    in_feats, n_hidden, n_classes, n_layers = 16, 32, 8, 3
    # node counts shrink per block (DGL block semantics: dst nodes prefix of src nodes)
    n_src, n_dst0, n_dst1, n_dst2 = 48, 24, 16, 8

    model = DistSAGEPallas(in_feats, n_hidden, n_classes, n_layers, k_model)

    x = jax.random.normal(k_x, (n_src, in_feats), jnp.float32)
    blocks = [
        make_mean_block(kb0, n_dst0, n_src),
        make_mean_block(kb1, n_dst1, n_dst0),
        make_mean_block(kb2, n_dst2, n_dst1),
    ]

    out = model.forward(blocks, x)
    out = jax.block_until_ready(out)
    assert out.shape == (n_dst2, n_classes)

    # sanity check against the pure-JAX f32 reference (loose tol for bf16 matmuls)
    ref = model.reference_forward(blocks, x)
    assert jnp.max(jnp.abs(out - ref)) < 0.1, "mismatch vs reference"

    print("KERNEL_OK")
</pallas_src>

<mosaic_0001>
module attributes {stable_mosaic.version = 11 : i64} {
  func.func @_fused_sage_kernel(%arg0: memref<32x48xbf16, #tpu.memory_space<vmem>>, %arg1: memref<16x32xbf16, #tpu.memory_space<vmem>>, %arg2: memref<16x16xbf16, #tpu.memory_space<vmem>>, %arg3: memref<48x128xbf16, #tpu.memory_space<vmem>>, %arg4: memref<256x128xbf16, #tpu.memory_space<vmem>>, %arg5: memref<1x128xf32, #tpu.memory_space<vmem>>, %arg6: memref<256x128xbf16, #tpu.memory_space<vmem>>, %arg7: memref<1x128xf32, #tpu.memory_space<vmem>>, %arg8: memref<256x128xbf16, #tpu.memory_space<vmem>>, %arg9: memref<1x128xf32, #tpu.memory_space<vmem>>, %arg10: memref<16x128xf32, #tpu.memory_space<vmem>>) attributes {dimension_semantics = [], scalar_prefetch = 0 : i64, scratch_operands = 0 : i64, tpu.core_type = #tpu.core_type<tc>} {
    %c0 = arith.constant 0 : index
    %c0_0 = arith.constant 0 : index
    %0 = vector.load %arg3[%c0, %c0_0] : memref<48x128xbf16, #tpu.memory_space<vmem>>, vector<48x128xbf16>
    %c0_1 = arith.constant 0 : index
    %c0_2 = arith.constant 0 : index
    %1 = vector.load %arg0[%c0_1, %c0_2] : memref<32x48xbf16, #tpu.memory_space<vmem>>, vector<32x48xbf16>
    %c0_3 = arith.constant 0 : index
    %c0_4 = arith.constant 0 : index
    %2 = vector.load %arg4[%c0_3, %c0_4] : memref<256x128xbf16, #tpu.memory_space<vmem>>, vector<256x128xbf16>
    %c0_5 = arith.constant 0 : index
    %c0_6 = arith.constant 0 : index
    %3 = vector.load %arg5[%c0_5, %c0_6] : memref<1x128xf32, #tpu.memory_space<vmem>>, vector<1x128xf32>
    %cst = arith.constant dense<0.000000e+00> : vector<32x128xf32>
    %4 = tpu.matmul %1, %0, %cst {dimension_numbers = #tpu.dot_dimension_numbers<[1], [0], [0], [1], [0, 0, 1, 1], [], []>} : vector<32x48xbf16>, vector<48x128xbf16>, vector<32x128xf32> -> vector<32x128xf32>
    %5 = vector.extract_strided_slice %0 {offsets = [0, 0], sizes = [32, 128], strides = [1, 1]} : vector<48x128xbf16> to vector<32x128xbf16>
    %6 = arith.truncf %4 : vector<32x128xf32> to vector<32x128xbf16>
    %7 = tpu.concatenate %5, %6 in 1 : vector<32x128xbf16>, vector<32x128xbf16> -> vector<32x256xbf16>
    %cst_7 = arith.constant dense<0.000000e+00> : vector<32x128xf32>
    %8 = tpu.matmul %7, %2, %cst_7 {dimension_numbers = #tpu.dot_dimension_numbers<[1], [0], [0], [1], [0, 0, 1, 1], [], []>} : vector<32x256xbf16>, vector<256x128xbf16>, vector<32x128xf32> -> vector<32x128xf32>
    %9 = vector.broadcast %3 : vector<1x128xf32> to vector<32x128xf32>
    %10 = arith.addf %8, %9 : vector<32x128xf32>
    %cst_8 = arith.constant 0.000000e+00 : f32
    %11 = vector.broadcast %cst_8 : f32 to vector<32x128xf32>
    %12 = arith.maximumf %10, %11 : vector<32x128xf32>
    %13 = arith.truncf %12 : vector<32x128xf32> to vector<32x128xbf16>
    %c0_9 = arith.constant 0 : index
    %c0_10 = arith.constant 0 : index
    %14 = vector.load %arg1[%c0_9, %c0_10] : memref<16x32xbf16, #tpu.memory_space<vmem>>, vector<16x32xbf16>
    %c0_11 = arith.constant 0 : index
    %c0_12 = arith.constant 0 : index
    %15 = vector.load %arg6[%c0_11, %c0_12] : memref<256x128xbf16, #tpu.memory_space<vmem>>, vector<256x128xbf16>
    %c0_13 = arith.constant 0 : index
    %c0_14 = arith.constant 0 : index
    %16 = vector.load %arg7[%c0_13, %c0_14] : memref<1x128xf32, #tpu.memory_space<vmem>>, vector<1x128xf32>
    %cst_15 = arith.constant dense<0.000000e+00> : vector<16x128xf32>
    %17 = tpu.matmul %14, %13, %cst_15 {dimension_numbers = #tpu.dot_dimension_numbers<[1], [0], [0], [1], [0, 0, 1, 1], [], []>} : vector<16x32xbf16>, vector<32x128xbf16>, vector<16x128xf32> -> vector<16x128xf32>
    %18 = vector.extract_strided_slice %13 {offsets = [0, 0], sizes = [16, 128], strides = [1, 1]} : vector<32x128xbf16> to vector<16x128xbf16>
    %19 = arith.truncf %17 : vector<16x128xf32> to vector<16x128xbf16>
    %20 = tpu.concatenate %18, %19 in 1 : vector<16x128xbf16>, vector<16x128xbf16> -> vector<16x256xbf16>
    %cst_16 = arith.constant dense<0.000000e+00> : vector<16x128xf32>
    %21 = tpu.matmul %20, %15, %cst_16 {dimension_numbers = #tpu.dot_dimension_numbers<[1], [0], [0], [1], [0, 0, 1, 1], [], []>} : vector<16x256xbf16>, vector<256x128xbf16>, vector<16x128xf32> -> vector<16x128xf32>
    %22 = vector.broadcast %16 : vector<1x128xf32> to vector<16x128xf32>
    %23 = arith.addf %21, %22 : vector<16x128xf32>
    %cst_17 = arith.constant 0.000000e+00 : f32
    %24 = vector.broadcast %cst_17 : f32 to vector<16x128xf32>
    %25 = arith.maximumf %23, %24 : vector<16x128xf32>
    %26 = arith.truncf %25 : vector<16x128xf32> to vector<16x128xbf16>
    %c0_18 = arith.constant 0 : index
    %c0_19 = arith.constant 0 : index
    %27 = vector.load %arg2[%c0_18, %c0_19] : memref<16x16xbf16, #tpu.memory_space<vmem>>, vector<16x16xbf16>
    %c0_20 = arith.constant 0 : index
    %c0_21 = arith.constant 0 : index
    %28 = vector.load %arg8[%c0_20, %c0_21] : memref<256x128xbf16, #tpu.memory_space<vmem>>, vector<256x128xbf16>
    %c0_22 = arith.constant 0 : index
    %c0_23 = arith.constant 0 : index
    %29 = vector.load %arg9[%c0_22, %c0_23] : memref<1x128xf32, #tpu.memory_space<vmem>>, vector<1x128xf32>
    %cst_24 = arith.constant dense<0.000000e+00> : vector<16x128xf32>
    %30 = tpu.matmul %27, %26, %cst_24 {dimension_numbers = #tpu.dot_dimension_numbers<[1], [0], [0], [1], [0, 0, 1, 1], [], []>} : vector<16x16xbf16>, vector<16x128xbf16>, vector<16x128xf32> -> vector<16x128xf32>
    %31 = arith.truncf %30 : vector<16x128xf32> to vector<16x128xbf16>
    %32 = tpu.concatenate %26, %31 in 1 : vector<16x128xbf16>, vector<16x128xbf16> -> vector<16x256xbf16>
    %cst_25 = arith.constant dense<0.000000e+00> : vector<16x128xf32>
    %33 = tpu.matmul %32, %28, %cst_25 {dimension_numbers = #tpu.dot_dimension_numbers<[1], [0], [0], [1], [0, 0, 1, 1], [], []>} : vector<16x256xbf16>, vector<256x128xbf16>, vector<16x128xf32> -> vector<16x128xf32>
    %34 = vector.broadcast %29 : vector<1x128xf32> to vector<16x128xf32>
    %35 = arith.addf %33, %34 : vector<16x128xf32>
    %c0_26 = arith.constant 0 : index
    %c0_27 = arith.constant 0 : index
    %36 = vector.load %arg10[%c0_26, %c0_27] : memref<16x128xf32, #tpu.memory_space<vmem>>, vector<16x128xf32>
    tpu.vector_store %arg10[%c0_26, %c0_27], %35 {strides = array<i32>} : memref<16x128xf32, #tpu.memory_space<vmem>>, vector<16x128xf32>,
    return
  }
}

</mosaic_0001>

<bundles_post_ra>
// kernel: tpu_custom_call.1
= control target key start
LH: loop header
LB: loop body
LE: loop exit
PB: predicated region body
PF: predicated region fallthrough
CT: control target
= control target key end

     0   :  { %15 = vsyncpa [#allocation3], 0  ;;  %s1549_s0 = inlined_call_operand.hbm [shape: bf16[32,48], index: 0, kind: input, shape index: {}]   ;;  %s1550_s1 = inlined_call_operand.hbm [shape: bf16[16,32], index: 1, kind: input, shape index: {}]   ;;  %s1551_s2 = inlined_call_operand.hbm [shape: bf16[16,16], index: 2, kind: input, shape index: {}]   ;;  %s1552_s3 = inlined_call_operand.hbm [shape: bf16[48,128], index: 3, kind: input, shape index: {}]   ;;  %s1553_s4 = inlined_call_operand.hbm [shape: bf16[256,128], index: 4, kind: input, shape index: {}]   ;;  %s1554_s5 = inlined_call_operand.vmem [shape: f32[1,128], index: 5, kind: input, shape index: {}]   ;;  %s1555_s6 = inlined_call_operand.hbm [shape: bf16[256,128], index: 6, kind: input, shape index: {}]   ;;  %s1556_s7 = inlined_call_operand.vmem [shape: f32[1,128], index: 7, kind: input, shape index: {}]   ;;  %s1557_s8 = inlined_call_operand.hbm [shape: bf16[256,128], index: 8, kind: input, shape index: {}]   ;;  %s1558_s9 = inlined_call_operand.vmem [shape: f32[1,128], index: 9, kind: input, shape index: {}]   ;;  %s1559_s10 = inlined_call_operand.hbm [shape: f32[16,128], index: 10, kind: output, shape index: {}]  }
   0x1   :  { %16 = vsyncpa [#allocation6], 0 }
   0x2   :  { %17 = vsyncpa [#allocation9], 0 }
   0x3   :  { %18 = vsyncpa [#allocation12], 0 }
   0x4   :  { %19 = vsyncpa [#allocation4], 0  ;;  %s1324_s13 = smov [#allocation5]   ;;  %s1325_s15 = smov [#allocation8]  }
   0x5   :  { %s37_s14 = sshll.u32 %s1324_s13, 4  ;;  %s61_s16 = sshll.u32 %s1325_s15, 4  ;;  %s38_s14 = int_to_ptr.vmem [resolvable:$true] %s37_s14  ;;  %s1393_s16 = int_to_ptr.vmem [resolvable:$true] %s61_s16 }
   0x6   :  { %s1138_s19 = scalar_lea.hbm %s1550_s1, 128 }
   0x7   :  { %p1139_p0 = scmp.ne.s32.totalorder %s1550_s1, %s1138_s19  ;;  %p1142_p1 = scmp.lt.u32.totalorder %s1138_s19, %s1550_s1 }
   0x9   :  { %p1144_p2 = pnand %p1142_p1, %p1139_p0 }
   0xb   :  { %1147 = shalt.err (!%p1144_p2)
}
   0xc   :  { %s1148_s24 = scalar_lea.vmem %s38_s14, 128  ;;  %p1153_p4 = scmp.lt.s32.totalorder %s38_s14, %s38_s14 }
   0xd   :  { %p1149_p3 = scmp.ne.s32.totalorder %s38_s14, %s1148_s24  ;;  %p1154_p5 = scmp.lt.s32.totalorder %s1148_s24, %s1148_s24 }
   0xf   :  { %p1155_p6 = por %p1154_p5, %p1153_p4 }
  0x11   :  { %p1156_p7 = pnand %p1155_p6, %p1149_p3 }
  0x13   :  { %1159 = shalt.err (!%p1156_p7)
}
  0x14   :  { %s1326_s25 = smov 64   ;;  %s1327_s26 = smov 4  }
  0x15   :  { %43 = dma.hbm_to_vmem [thread:$0]  %s1550_s1, 128, %s38_s14, [#allocation6], %s1326_s25, %s1326_s25, %s1327_s26  }
  0x16   :  { %s1160_s11 = scalar_lea.hbm %s1552_s3, 384 }
  0x17   :  { %p1161_p8 = scmp.ne.s32.totalorder %s1552_s3, %s1160_s11  ;;  %p1164_p9 = scmp.lt.u32.totalorder %s1160_s11, %s1552_s3 }
  0x19   :  { %p1166_p10 = pnand %p1164_p9, %p1161_p8 }
  0x1b   :  { %1169 = shalt.err (!%p1166_p10)
}
  0x1c   :  { %s1170_s18 = scalar_lea.vmem %s1393_s16, 384  ;;  %p1175_p12 = scmp.lt.s32.totalorder %s1393_s16, %s1393_s16 }
  0x1d   :  { %p1171_p11 = scmp.ne.s32.totalorder %s1393_s16, %s1170_s18  ;;  %p1176_p13 = scmp.lt.s32.totalorder %s1170_s18, %s1170_s18 }
  0x1f   :  { %p1177_p0 = por %p1176_p13, %p1175_p12 }
  0x21   :  { %p1178_p1 = pnand %p1177_p0, %p1171_p11 }
  0x23   :  { %1181 = shalt.err (!%p1178_p1)
}
  0x24   :  { %67 = dma.hbm_to_vmem [thread:$0]  %s1552_s3, 384, %s1393_s16, [#allocation9], %s1326_s25, %s1326_s25, %s1327_s26  }
  0x25   :  { %s1328_s19 = smov [#allocation11]   ;;  %s1329_s21 = smov [#allocation2]  }
  0x26   :  { %s87_s20 = sshll.u32 %s1328_s19, 4  ;;  %s25_s22 = sshll.u32 %s1329_s21, 4  ;;  %s88_s20 = int_to_ptr.vmem [resolvable:$true] %s87_s20  ;;  %s1430_s22 = int_to_ptr.vmem [resolvable:$true] %s25_s22 }
  0x27   :  { %s1182_s27 = scalar_lea.hbm %s1555_s6, 2048 }
  0x28   :  { %p1183_p2 = scmp.ne.s32.totalorder %s1555_s6, %s1182_s27  ;;  %p1186_p3 = scmp.lt.u32.totalorder %s1182_s27, %s1555_s6 }
  0x2a   :  { %p1188_p4 = pnand %p1186_p3, %p1183_p2 }
  0x2c   :  { %1191 = shalt.err (!%p1188_p4)
}
  0x2d   :  { %s1192_s3 = scalar_lea.vmem %s88_s20, 2048  ;;  %p1197_p6 = scmp.lt.s32.totalorder %s88_s20, %s88_s20 }
  0x2e   :  { %p1193_p5 = scmp.ne.s32.totalorder %s88_s20, %s1192_s3  ;;  %p1198_p7 = scmp.lt.s32.totalorder %s1192_s3, %s1192_s3 }
  0x30   :  { %p1199_p8 = por %p1198_p7, %p1197_p6 }
  0x32   :  { %p1200_p9 = pnand %p1199_p8, %p1193_p5 }
  0x34   :  { %1203 = shalt.err (!%p1200_p9)
}
  0x35   :  { %93 = dma.hbm_to_vmem [thread:$0]  %s1555_s6, 2048, %s88_s20, [#allocation12], %s1326_s25, %s1326_s25, %s1327_s26  }
  0x36   :  { %s1204_s17 = scalar_lea.hbm %s1549_s0, 256 }
  0x37   :  { %p1205_p10 = scmp.ne.s32.totalorder %s1549_s0, %s1204_s17  ;;  %p1208_p11 = scmp.lt.u32.totalorder %s1204_s17, %s1549_s0 }
  0x39   :  { %p1210_p12 = pnand %p1208_p11, %p1205_p10 }
  0x3b   :  { %1213 = shalt.err (!%p1210_p12)
}
  0x3c   :  { %s1214_s21 = scalar_lea.vmem %s1430_s22, 256  ;;  %p1219_p0 = scmp.lt.s32.totalorder %s1430_s22, %s1430_s22 }
  0x3d   :  { %p1215_p13 = scmp.ne.s32.totalorder %s1430_s22, %s1214_s21  ;;  %p1220_p1 = scmp.lt.s32.totalorder %s1214_s21, %s1214_s21 }
  0x3f   :  { %p1221_p2 = por %p1220_p1, %p1219_p0 }
  0x41   :  { %p1222_p3 = pnand %p1221_p2, %p1215_p13 }
  0x43   :  { %1225 = shalt.err (!%p1222_p3)
}
  0x44   :  { %31 = dma.hbm_to_vmem [thread:$0]  %s1549_s0, 256, %s1430_s22, [#allocation3], %s1326_s25, %s1326_s25, %s1327_s26  }
  0x45   :  { %s1330_s23 = smov [#allocation7]   ;;  %s1331_s27 = smov [#allocation10]  }
  0x46   :  { %s49_s24 = sshll.u32 %s1330_s23, 4  ;;  %s73_s28 = sshll.u32 %s1331_s27, 4  ;;  %s50_s24 = int_to_ptr.vmem [resolvable:$true] %s49_s24  ;;  %s1467_s28 = int_to_ptr.vmem [resolvable:$true] %s73_s28 }
  0x47   :  { %s1226_s11 = scalar_lea.hbm %s1551_s2, 128 }
  0x48   :  { %p1227_p4 = scmp.ne.s32.totalorder %s1551_s2, %s1226_s11  ;;  %p1230_p5 = scmp.lt.u32.totalorder %s1226_s11, %s1551_s2 }
  0x4a   :  { %p1232_p6 = pnand %p1230_p5, %p1227_p4 }
  0x4c   :  { %1235 = shalt.err (!%p1232_p6)
}
  0x4d   :  { %s1236_s0 = scalar_lea.vmem %s50_s24, 128  ;;  %p1241_p8 = scmp.lt.s32.totalorder %s50_s24, %s50_s24 }
  0x4e   :  { %p1237_p7 = scmp.ne.s32.totalorder %s50_s24, %s1236_s0  ;;  %p1242_p9 = scmp.lt.s32.totalorder %s1236_s0, %s1236_s0 }
  0x50   :  { %p1243_p10 = por %p1242_p9, %p1241_p8 }
  0x52   :  { %p1244_p11 = pnand %p1243_p10, %p1237_p7 }
  0x54   :  { %1247 = shalt.err (!%p1244_p11)
}
  0x55   :  { %55 = dma.hbm_to_vmem [thread:$0]  %s1551_s2, 128, %s50_s24, [#allocation6], %s1326_s25, %s1326_s25, %s1327_s26  }
  0x56   :  { %s1248_s1 = scalar_lea.hbm %s1553_s4, 2048 }
  0x57   :  { %p1249_p12 = scmp.ne.s32.totalorder %s1553_s4, %s1248_s1  ;;  %p1252_p13 = scmp.lt.u32.totalorder %s1248_s1, %s1553_s4 }
  0x59   :  { %p1254_p0 = pnand %p1252_p13, %p1249_p12 }
  0x5b   :  { %1257 = shalt.err (!%p1254_p0)
}
  0x5c   :  { %s1258_s20 = scalar_lea.vmem %s1467_s28, 2048  ;;  %p1263_p2 = scmp.lt.s32.totalorder %s1467_s28, %s1467_s28 }
  0x5d   :  { %p1259_p1 = scmp.ne.s32.totalorder %s1467_s28, %s1258_s20  ;;  %p1264_p3 = scmp.lt.s32.totalorder %s1258_s20, %s1258_s20 }
  0x5f   :  { %p1265_p4 = por %p1264_p3, %p1263_p2 }
  0x61   :  { %p1266_p5 = pnand %p1265_p4, %p1259_p1 }
  0x63   :  { %1269 = shalt.err (!%p1266_p5)
}
  0x64   :  { %79 = dma.hbm_to_vmem [thread:$0]  %s1553_s4, 2048, %s1467_s28, [#allocation9], %s1326_s25, %s1326_s25, %s1327_s26  }
  0x65   :  { %s1332_s24 = smov [#allocation13]   ;;  %s1270_s11 = scalar_lea.hbm %s1557_s8, 2048 }
  0x66   :  { %s101_s27 = sshll.u32 %s1332_s24, 4  ;;  %p1271_p6 = scmp.ne.s32.totalorder %s1557_s8, %s1270_s11  ;;  %s102_s27 = int_to_ptr.vmem [resolvable:$true] %s101_s27 }
  0x67   :  { %p1274_p7 = scmp.lt.u32.totalorder %s1270_s11, %s1557_s8 }
  0x69   :  { %p1276_p8 = pnand %p1274_p7, %p1271_p6 }
  0x6b   :  { %1279 = shalt.err (!%p1276_p8)
}
  0x6c   :  { %s1280_s0 = scalar_lea.vmem %s102_s27, 2048  ;;  %p1285_p10 = scmp.lt.s32.totalorder %s102_s27, %s102_s27 }
  0x6d   :  { %p1281_p9 = scmp.ne.s32.totalorder %s102_s27, %s1280_s0  ;;  %p1286_p11 = scmp.lt.s32.totalorder %s1280_s0, %s1280_s0 }
  0x6f   :  { %p1287_p12 = por %p1286_p11, %p1285_p10 }
  0x71   :  { %p1288_p13 = pnand %p1287_p12, %p1281_p9 }
  0x73   :  { %1291 = shalt.err (!%p1288_p13)
}
  0x74   :  { %107 = dma.hbm_to_vmem [thread:$0]  %s1557_s8, 2048, %s102_s27, [#allocation12], %s1326_s25, %s1326_s25, %s1327_s26  }
  0x75   :  { %1314 = dma.done.wait [#allocation3], 256  }
  0x76   :  { %1315 = vsyncadd [#allocation3], 4294967040 }
  0x77   :  { %1316 = dma.done.wait [#allocation6], 256  }
  0x78   :  { %1317 = vsyncadd [#allocation6], 4294967040 }
  0x79   :  { %1318 = dma.done.wait [#allocation9], 2432  }
  0x7a   :  { %1319 = vsyncadd [#allocation9], 4294964864 }
  0x7b   :  { %1320 = dma.done.wait [#allocation12], 4096  }
  0x7c   :  { %1321 = vsyncadd [#allocation12], 4294963200  ;;  %v1083_v0 = vld [vmem:[#allocation8] sm:$0xff]   ;;  %v1084_v1 = vld [vmem:[#allocation8 + $0x8] sm:$0xff]   ;;  %vm203_vm0 = vcmask 392192   ;;  %v1333_v27 = vmov 0.0  }
  0x7d   :  { %1045 = vmatprep.subr.bf16.mxu0 %v1083_v0  ;;  %v1086_v2 = vld [vmem:[#allocation2] sm:$0xff]   ;;  %v1085_v3 = vld [vmem:[#allocation8 + $0x10] sm:$0xff]   ;;  %v1088_v4 = vld [vmem:[#allocation10 + $0x40] sm:$0xff]   ;;  %vm1334_vm1 = vmmov 0   ;;  %vm458_vm2 = vcmask 261120   ;;  %vm690_vm3 = vcmask 130048  }
  0x7e   :  { %1046 = vmatpush3.bf16.msra.mxu0 %v1083_v0  ;;  %1051 = vmatprep.mubr.msk.bf16.mxu0 %vm203_vm0, %v1086_v2  ;;  %v1089_v5 = vld [vmem:[#allocation10] sm:$0xff]   ;;  %v1090_v6 = vld [vmem:[#allocation10 + $0x48] sm:$0xff]   ;;  %v1092_v8 = vld [vmem:[#allocation10 + $0x50] sm:$0xff]   ;;  %s1335_s15 = smov [#allocation14]  }
  0x7f   :  { %1047 = vmatprep.subr.bf16.mxu0 %v1084_v1  ;;  %968 = vmatprep.subr.bf16.mxu1 %v1088_v4  ;;  %v1091_v7 = vld [vmem:[#allocation10 + $0x8] sm:$0xff]   ;;  %v1087_v9 = vld [vmem:[#allocation2 + $0x8] sm:$0xff]   ;;  %v1094_v11 = vld [vmem:[#allocation10 + $0x58] sm:$0xff]   ;;  %s886_s17 = sshll.u32 %s1335_s15, 4  ;;  %s887_s17 = int_to_ptr.vmem [resolvable:$true] %s886_s17 }
  0x80   :  { %969 = vmatpush3.bf16.msra.mxu1 %v1089_v5  ;;  %v1093_v10 = vld [vmem:[#allocation10 + $0x10] sm:$0xff]   ;;  %v1095_v12 = vld [vmem:[#allocation10 + $0x18] sm:$0xff]   ;;  %v1096_v13 = vld [vmem:[#allocation10 + $0x60] sm:$0xff]   ;;  %s1292_s18 = scalar_lea.vmem %s887_s17, 256  ;;  %p1297_p1 = scmp.lt.s32.totalorder %s887_s17, %s887_s17 }
  0x81   :  { %970 = vmatprep.subr.bf16.mxu1 %v1090_v6  ;;  %v1097_v14 = vld [vmem:[#allocation10 + $0x20] sm:$0xff]   ;;  %v1098_v15 = vld [vmem:[#allocation10 + $0x68] sm:$0xff]   ;;  %v1100_v17 = vld [vmem:[#allocation10 + $0x70] sm:$0xff]   ;;  %p1293_p0 = scmp.ne.s32.totalorder %s887_s17, %s1292_s18  ;;  %p1298_p2 = scmp.lt.s32.totalorder %s1292_s18, %s1292_s18 }
  0x82   :  { %1048 = vmatpush3.bf16.msra.mxu0 %v1084_v1  ;;  %v1099_v16 = vld [vmem:[#allocation10 + $0x28] sm:$0xff]   ;;  %v1101_v18 = vld [vmem:[#allocation10 + $0x30] sm:$0xff]   ;;  %v1102_v19 = vld [vmem:[#allocation10 + $0x78] sm:$0xff]  }
  0x83   :  { %1049 = vmatprep.subr.bf16.mxu0 %v1085_v3  ;;  %v1103_v20 = vld [vmem:[#allocation10 + $0x38] sm:$0xff]   ;;  %v908_v29 = vld [vmem:[%s1554_s5] ss:$0 sm:$0xff]  ;;  %v1105_v50 = vld [vmem:[#allocation11 + $0x40] sm:$0xff]   ;;  %p1299_p3 = por %p1298_p2, %p1297_p1 }
  0x84   :  { %971 = vmatpush3.bf16.msra.mxu1 %v1091_v7  ;;  %v1104_v52 = vld [vmem:[#allocation5] sm:$0xff]   ;;  %v1106_v53 = vld [vmem:[#allocation11] sm:$0xff]   ;;  %v1107_v54 = vld [vmem:[#allocation11 + $0x48] sm:$0xff]  }
  0x85   :  { %972 = vmatprep.subr.bf16.mxu1 %v1092_v8  ;;  %v1108_v55 = vld [vmem:[#allocation11 + $0x8] sm:$0xff]   ;;  %v1109_v56 = vld [vmem:[#allocation11 + $0x50] sm:$0xff]   ;;  %v1111_v58 = vld [vmem:[#allocation11 + $0x58] sm:$0xff]   ;;  %p1300_p4 = pnand %p1299_p3, %p1293_p0 }
  0x86   :  { %1050 = vmatpush3.bf16.msra.mxu0 %v1085_v3  ;;  %v1110_v57 = vld [vmem:[#allocation11 + $0x10] sm:$0xff]   ;;  %v1112_v59 = vld [vmem:[#allocation11 + $0x18] sm:$0xff]   ;;  %v1113_v60 = vld [vmem:[#allocation11 + $0x60] sm:$0xff]  }
  0x87   :  { %1055 = vmatprep.subr.bf16.mxu0 %v1333_v27  ;;  %v1114_v61 = vld [vmem:[#allocation11 + $0x20] sm:$0xff]   ;;  %v1115_v62 = vld [vmem:[#allocation11 + $0x68] sm:$0xff]   ;;  %v1119_v2 = vld [vmem:[#allocation11 + $0x78] sm:$0xff]  }
  0x88   :  { %973 = vmatpush3.bf16.msra.mxu1 %v1093_v10  ;;  %v1116_v63 = vld [vmem:[#allocation11 + $0x28] sm:$0xff]   ;;  %v1120_v3 = vld [vmem:[#allocation11 + $0x38] sm:$0xff]   ;;  %v1123_v10 = vld [vmem:[#allocation13] sm:$0xff]  }
  0x89   :  { %1052 = vmatmul.mubr.msk.bf16.vlgmr.msra.gmra.mrb[0].mxu0 %vm203_vm0, %v1087_v9  ;;  %974 = vmatprep.subr.bf16.mxu1 %v1094_v11  ;;  %v1122_v9 = vld [vmem:[#allocation13 + $0x40] sm:$0xff]   ;;  %v1124_v11 = vld [vmem:[#allocation13 + $0x48] sm:$0xff]  }
  0x8a   :  { %1059 = vmatprep.mubr.msk.bf16.mxu0 %vm1334_vm1, %v1333_v27 }
  0x8c   :  { %975 = vmatpush3.bf16.msra.mxu1 %v1095_v12  ;;  %v1125_v12 = vld [vmem:[#allocation13 + $0x8] sm:$0xff]  }
  0x8d   :  { %976 = vmatprep.subr.bf16.mxu1 %v1096_v13  ;;  %v1126_v13 = vld [vmem:[#allocation13 + $0x50] sm:$0xff]  }
  0x90   :  { %977 = vmatpush3.bf16.msra.mxu1 %v1097_v14  ;;  %v1127_v14 = vld [vmem:[#allocation13 + $0x10] sm:$0xff]  }
  0x91   :  { %978 = vmatprep.subr.bf16.mxu1 %v1098_v15  ;;  %v1128_v15 = vld [vmem:[#allocation13 + $0x58] sm:$0xff]  }
  0x94   :  { %979 = vmatpush3.bf16.msra.mxu1 %v1099_v16  ;;  %v1129_v16 = vld [vmem:[#allocation13 + $0x18] sm:$0xff]  }
  0x95   :  { %980 = vmatprep.subr.bf16.mxu1 %v1100_v17  ;;  %v1130_v17 = vld [vmem:[#allocation13 + $0x60] sm:$0xff]  }
  0x98   :  { %981 = vmatpush3.bf16.msra.mxu1 %v1101_v18  ;;  %v1131_v18 = vld [vmem:[#allocation13 + $0x20] sm:$0xff]  }
  0x99   :  { %982 = vmatprep.subr.bf16.mxu1 %v1102_v19  ;;  %v1132_v19 = vld [vmem:[#allocation13 + $0x68] sm:$0xff]  }
  0x9c   :  { %983 = vmatpush3.bf16.msra.mxu1 %v1103_v20  ;;  %v1133_v20 = vld [vmem:[#allocation13 + $0x28] sm:$0xff]  }
  0x9d   :  { %1023 = vmatprep.subr.bf16.mxu1 %v1122_v9 }
 0x15c   :  { %v1053_v21 = vpop.f32.mrb[0].mxu0 }
 0x15d   :  { %v244_v22 = vpop.f32.mrb[1].mxu0 }
 0x15e   :  { %v1054_v23 = vpop.f32.mrb[2].mxu0 }
 0x15f   :  { %v260_v24 = vpack.c.bf16 %v1054_v23, %v1053_v21  ;;  %v247_v25 = vpop.f32.mrb[3].mxu0  ;;  %v1134_v21 = vld [vmem:[#allocation13 + $0x70] sm:$0xff]  }
 0x160   :  { %v259_v26 = vpack.c.bf16 %v247_v25, %v244_v22  ;;  %v1135_v22 = vld [vmem:[#allocation13 + $0x30] sm:$0xff]  }
 0x162   :  { %395 = vmatprep.mubr.bf16.mxu1 %v259_v26 }
 0x163   :  { %396 = vmatmul.mubr.bf16.vlgmr.msra.gmra.mrb[0].mxu1 %v1083_v0  ;;  %v1117_v0 = vld [vmem:[#allocation11 + $0x70] sm:$0xff]  }
 0x164   :  { %403 = vmatprep.mubr.bf16.mxu1 %v260_v24  ;;  %1024 = vmatpush3.bf16.msra.mxu1 %v1123_v10  ;;  %v927_v24 = vld [vmem:[%s1556_s7] ss:$0 sm:$0xff] }
 0x165   :  { %1025 = vmatprep.subr.bf16.mxu1 %v1124_v11 }
 0x168   :  { %1026 = vmatpush3.bf16.msra.mxu1 %v1125_v12 }
 0x169   :  { %1027 = vmatprep.subr.bf16.mxu1 %v1126_v13 }
 0x16b   :  { %404 = vmatmul.mubr.bf16.gmra.mrb[4].mxu1 %v1084_v1  ;;  %v1118_v1 = vld [vmem:[#allocation11 + $0x30] sm:$0xff]  }
 0x16c   :  { %1028 = vmatpush3.bf16.msra.mxu1 %v1127_v14 }
 0x16d   :  { %1029 = vmatprep.subr.bf16.mxu1 %v1128_v15 }
 0x170   :  { %1030 = vmatpush3.bf16.msra.mxu1 %v1129_v16 }
 0x171   :  { %1031 = vmatprep.subr.bf16.mxu1 %v1130_v17 }
 0x174   :  { %1032 = vmatpush3.bf16.msra.mxu1 %v1131_v18 }
 0x175   :  { %1033 = vmatprep.subr.bf16.mxu1 %v1132_v19 }
 0x178   :  { %1034 = vmatpush3.bf16.msra.mxu1 %v1133_v20 }
 0x179   :  { %1035 = vmatprep.subr.bf16.mxu1 %v1134_v21 }
 0x17c   :  { %1036 = vmatpush3.bf16.msra.mxu1 %v1135_v22 }
 0x236   :  { %v984_v28 = vpop.f32.mrb[0].mxu1 }
 0x237   :  { %v985_v30 = vpop.f32.mrb[1].mxu1 }
 0x238   :  { %v986_v31 = vadd.f32 %v985_v30, %v984_v28  ;;  %v987_v32 = vpop.f32.mrb[2].mxu1 }
 0x239   :  { %v988_v33 = vpop.f32.mrb[3].mxu1 }
 0x23a   :  { %v398_v34 = vadd.f32 %v986_v31, %v908_v29  ;;  %v989_v35 = vadd.f32 %v988_v33, %v987_v32 }
 0x23c   :  { %v401_v36 = vadd.f32 %v989_v35, %v908_v29  ;;  %v412_v37 = vmax.f32 %v398_v34, 0.0  ;;  %v1121_v35 = vld [vmem:[#allocation7] sm:$0xff]  }
 0x23e   :  { %v413_v38 = vmax.f32 %v401_v36, 0.0  ;;  %v990_v39 = vpop.f32.mrb[4].mxu1  ;;  %v1136_v36 = vld [vmem:[#allocation13 + $0x78] sm:$0xff]  }
 0x23f   :  { %v991_v40 = vpop.f32.mrb[5].mxu1  ;;  %1037 = vmatprep.subr.bf16.mxu1 %v1136_v36 }
 0x240   :  { %v416_v41 = vpack.c.bf16 %v413_v38, %v412_v37  ;;  %v992_v42 = vadd.f32 %v991_v40, %v990_v39  ;;  %v993_v43 = vpop.f32.mrb[6].mxu1  ;;  %v1137_v37 = vld [vmem:[#allocation13 + $0x38] sm:$0xff]  }
 0x241   :  { %v994_v44 = vpop.f32.mrb[7].mxu1  ;;  %1038 = vmatpush3.bf16.msra.mxu1 %v1137_v37 }
 0x242   :  { %v406_v45 = vadd.f32 %v992_v42, %v908_v29  ;;  %v995_v46 = vadd.f32 %v994_v44, %v993_v43  ;;  %1056 = vmatpush3.bf16.msra.mxu0 %v416_v41  ;;  %v946_v44 = vld [vmem:[%s1558_s9] ss:$0 sm:$0xff] }
 0x243   :  { %1057 = vmatprep.subr.bf16.mxu0 %v1333_v27 }
 0x244   :  { %v409_v47 = vadd.f32 %v995_v46, %v908_v29  ;;  %v414_v48 = vmax.f32 %v406_v45, 0.0 }
 0x246   :  { %v415_v49 = vmax.f32 %v409_v47, 0.0 }
 0x248   :  { %v417_v51 = vpack.c.bf16 %v415_v49, %v414_v48 }
 0x24a   :  { %1058 = vmatpush3.bf16.msra.mxu0 %v417_v51 }
 0x24b   :  { %999 = vmatprep.subr.bf16.mxu0 %v1105_v50 }
 0x24d   :  { %1060 = vmatmul.mubr.msk.bf16.vlgmr.msra.gmra.mrb[4].mxu0 %vm458_vm2, %v1104_v52 }
 0x24e   :  { %1000 = vmatpush3.bf16.msra.mxu0 %v1106_v53 }
 0x24f   :  { %1001 = vmatprep.subr.bf16.mxu0 %v1107_v54 }
 0x252   :  { %1002 = vmatpush3.bf16.msra.mxu0 %v1108_v55 }
 0x253   :  { %1003 = vmatprep.subr.bf16.mxu0 %v1109_v56 }
 0x256   :  { %1004 = vmatpush3.bf16.msra.mxu0 %v1110_v57 }
 0x257   :  { %1005 = vmatprep.subr.bf16.mxu0 %v1111_v58 }
 0x25a   :  { %1006 = vmatpush3.bf16.msra.mxu0 %v1112_v59 }
 0x25b   :  { %1007 = vmatprep.subr.bf16.mxu0 %v1113_v60 }
 0x25e   :  { %1008 = vmatpush3.bf16.msra.mxu0 %v1114_v61 }
 0x25f   :  { %1009 = vmatprep.subr.bf16.mxu0 %v1115_v62 }
 0x262   :  { %1010 = vmatpush3.bf16.msra.mxu0 %v1116_v63 }
 0x263   :  { %1011 = vmatprep.subr.bf16.mxu0 %v1117_v0 }
 0x266   :  { %1012 = vmatpush3.bf16.msra.mxu0 %v1118_v1 }
 0x267   :  { %1013 = vmatprep.subr.bf16.mxu0 %v1119_v2 }
 0x26a   :  { %1014 = vmatpush3.bf16.msra.mxu0 %v1120_v3 }
 0x26b   :  { %1063 = vmatprep.subr.bf16.mxu0 %v1333_v27 }
 0x320   :  { %v496_v4 = vpop.f32.mrb[4].mxu0 }
 0x321   :  { %v1061_v5 = vpop.f32.mrb[5].mxu0 }
 0x322   :  { %v499_v6 = vpop.f32.mrb[6].mxu0 }
 0x323   :  { %v503_v7 = vpack.c.bf16 %v499_v6, %v496_v4  ;;  %v1062_v8 = vpop.f32.mrb[7].mxu0 }
 0x325   :  { %638 = vmatprep.mubr.bf16.mxu0 %v503_v7 }
 0x326   :  { %639 = vmatmul.mubr.bf16.vlgmr.msra.gmra.mrb[8].mxu0 %v416_v41 }
 0x327   :  { %1065 = vmatprep.mubr.msk.bf16.mxu0 %vm1334_vm1, %v1333_v27 }
 0x3f9   :  { %v1015_v23 = vpop.f32.mrb[8].mxu0 }
 0x3fa   :  { %v1016_v25 = vpop.f32.mrb[9].mxu0 }
 0x3fb   :  { %v1017_v26 = vadd.f32 %v1016_v25, %v1015_v23  ;;  %v1018_v27 = vpop.f32.mrb[10].mxu0 }
 0x3fc   :  { %v1019_v28 = vpop.f32.mrb[11].mxu0 }
 0x3fd   :  { %v641_v29 = vadd.f32 %v1017_v26, %v927_v24  ;;  %v1020_v30 = vadd.f32 %v1019_v28, %v1018_v27 }
 0x3ff   :  { %v644_v31 = vadd.f32 %v1020_v30, %v927_v24  ;;  %v647_v32 = vmax.f32 %v641_v29, 0.0 }
 0x401   :  { %v648_v33 = vmax.f32 %v644_v31, 0.0 }
 0x403   :  { %v649_v34 = vpack.c.bf16 %v648_v33, %v647_v32 }
 0x405   :  { %1064 = vmatpush3.bf16.msra.mxu0 %v649_v34 }
 0x408   :  { %1066 = vmatmul.mubr.msk.bf16.vlgmr.msra.gmra.mrb[12].mxu0 %vm690_vm3, %v1121_v35 }
 0x4db   :  { %v728_v38 = vpop.f32.mrb[12].mxu0 }
 0x4dc   :  { %v1067_v39 = vpop.f32.mrb[13].mxu0 }
 0x4dd   :  { %v731_v40 = vpop.f32.mrb[14].mxu0 }
 0x4de   :  { %v735_v41 = vpack.c.bf16 %v731_v40, %v728_v38  ;;  %v1068_v42 = vpop.f32.mrb[15].mxu0 }
 0x4e0   :  { %870 = vmatprep.mubr.bf16.mxu1 %v735_v41 }
 0x4e1   :  { %871 = vmatmul.mubr.bf16.vlgmr.msra.gmra.mrb[8].mxu1 %v649_v34 }
 0x5b4   :  { %v1039_v43 = vpop.f32.mrb[8].mxu1 }
 0x5b5   :  { %v1040_v45 = vpop.f32.mrb[9].mxu1 }
 0x5b6   :  { %v1041_v46 = vadd.f32 %v1040_v45, %v1039_v43  ;;  %v1042_v47 = vpop.f32.mrb[10].mxu1 }
 0x5b7   :  { %v1043_v48 = vpop.f32.mrb[11].mxu1 }
 0x5b8   :  { %v873_v49 = vadd.f32 %v1041_v46, %v946_v44  ;;  %v1044_v50 = vadd.f32 %v1043_v48, %v1042_v47 }
 0x5ba   :  { %879 = vst [vmem:[#allocation14] sm:$0xff] %v873_v49  ;;  %v876_v51 = vadd.f32 %v1044_v50, %v946_v44 }
 0x5bc   :  { %880 = vst [vmem:[#allocation14 + $0x8] sm:$0xff] %v876_v51 }
 0x5bd   :  { %1303 = shalt.err (!%p1300_p4)
}
 0x5be   :  { %s1304_s14 = scalar_lea.hbm %s1559_s10, 256 }
 0x5bf   :  { %p1305_p5 = scmp.ne.s32.totalorder %s1559_s10, %s1304_s14  ;;  %p1308_p6 = scmp.lt.u32.totalorder %s1304_s14, %s1559_s10 }
 0x5c1   :  { %p1310_p7 = pnand %p1308_p6, %p1305_p5 }
 0x5c3   :  { %1313 = shalt.err (!%p1310_p7)
}
 0x5c4   :  { %s1336_s2 = smov 128   ;;  %s1337_s23 = smov 8  }
 0x5c5   :  { %892 = dma.vmem_to_hbm [thread:$0]  %s887_s17, 256, %s1559_s10, [#allocation4], %s1336_s2, %s1336_s2, %s1337_s23  }
 0x5c6   :  { %1322 = dma.done.wait [#allocation4], 256  }
 0x5c7   :  { %1323 = vsyncadd [#allocation4], 4294967040 }
 0x5c8   :  { %896 = vsyncpa [#allocation3], 1 }
 0x5c9   :  { %897 = vsyncpa [#allocation6], 1 }
 0x5ca   :  { %898 = vsyncpa [#allocation9], 1 }
 0x5cb   :  { %899 = vsyncpa [#allocation12], 1 }
 0x5cc   :  { %900 = vsyncpa [#allocation4], 1 }

</bundles_post_ra>
